<compile_context>
chip_gen: v7x
topology: tpu7x:2x2x1
jax: 0.10.0
libtpu: 0.0.40
codegen_flags: <defaults>
</compile_context>

<pallas_src>
import functools
import math

import jax
import jax.numpy as jnp
from jax.experimental import pallas as pl
from jax.experimental.pallas import tpu as pltpu

BN_EPS = 1e-5
_COMPUTE_DTYPE = jnp.bfloat16
_VMEM_LIMIT = 40 * 1024 * 1024      # safe on v5e/v6e (128 MiB) and v7x (64 MiB per core)
_ACC_BUDGET = 256 * 1024            # target f32 accumulator bytes per conv grid step


def _round_up(x, m):
    return (x + m - 1) // m * m


def _cdiv(a, b):
    return (a + b - 1) // b


def _largest_divisor(n, cap):
    best = 1
    for d in range(1, min(n, max(cap, 1)) + 1):
        if n % d == 0:
            best = d
    return best


def _pick_tn(n):
    # Multiples of 128 get a 256-wide (or exact) lane-dense tile; anything else
    # uses the full extent (always a legal block shape) so no N padding is needed.
    if n % 128 == 0:
        return min(256, n)
    return n


# --------------------------------------------------------------------------
# Pallas kernels
# --------------------------------------------------------------------------
def _mm_kernel(a_ref, b_ref, s_ref, t_ref, *rest, act, has_res):
    """out = act((A @ B) * scale + shift [+ residual]); bf16 in, f32 accumulate."""
    if has_res:
        r_ref, o_ref = rest
    else:
        (o_ref,) = rest
    y = jnp.dot(a_ref[...], b_ref[...], preferred_element_type=jnp.float32)
    y = y * s_ref[...] + t_ref[...]
    if has_res:
        y = y + r_ref[...].astype(jnp.float32)
    if act == "relu":
        y = jnp.maximum(y, 0.0)
    elif act == "sigmoid":
        y = jax.nn.sigmoid(y)
    o_ref[...] = y.astype(o_ref.dtype)


def _igemm_kernel(x_ref, w_ref, s_ref, t_ref, o_ref, *, kh, kcat, pw, tr, wout):
    """Implicit-GEMM stride-1 conv + folded BN + ReLU on a kw-concatenated image.

    x_ref: (1, Hpad*pw, kcat)   flattened padded image, kcat = kw*Cin (bf16), resident
    w_ref: (kh*kcat, TN)        dy-major weights (bf16)
    s_ref/t_ref: (1, TN)        folded BN scale/shift (f32)
    o_ref: (1, tr, wout, TN)    unpadded output row tile (bf16)
    """
    r = pl.program_id(2)
    base = r * (tr * pw)
    acc = None
    for i in range(kh):                                   # kh aligned dy taps, K = kw*Cin
        start = pl.multiple_of(base + i * pw, 8)
        lhs = x_ref[0, pl.ds(start, tr * pw), :]          # (tr*pw, kcat)
        rhs = w_ref[i * kcat:(i + 1) * kcat, :]           # (kcat, TN)
        y = jnp.dot(lhs, rhs, preferred_element_type=jnp.float32)
        acc = y if acc is None else acc + y
    y = jnp.maximum(acc * s_ref[...] + t_ref[...], 0.0).astype(o_ref.dtype)
    for t in range(tr):                                   # store only the valid width
        o_ref[0, t] = y[t * pw:t * pw + wout, :]


def _maxpool_kernel(x_ref, o_ref, *, w1, wout, tr):
    """3x3 / stride-2 max pool; padded image read once, column pairs packed in lanes.

    x_ref: (1, Hp*w1, 2*C)  padded col 2i -> lanes [0,C), col 2i+1 -> lanes [C,2C)
    o_ref: (1, tr, wout, C)
    """
    r = pl.program_id(1)
    c = o_ref.shape[-1]
    for t in range(tr):
        base = pl.multiple_of((2 * (r * tr + t)) * w1, 8)
        m = None
        for dy in range(3):
            row = x_ref[0, pl.ds(base + dy * w1, w1), :]              # (w1, 2C)
            rm = jnp.maximum(jnp.maximum(row[:wout, :c], row[:wout, c:]),
                             row[1:wout + 1, :c])
            m = rm if m is None else jnp.maximum(m, rm)
        o_ref[0, t] = m


# --------------------------------------------------------------------------
# Fused matmul wrapper (1x1 convs, FC)
# --------------------------------------------------------------------------
def matmul_scale_act(a, b, scale, shift, residual, act, out_dtype):
    """act((a @ b) * scale + shift [+ residual]).  a/b/residual bf16, scale/shift f32."""
    M, K = a.shape
    N = b.shape[1]
    Mp = _round_up(M, 8)
    if Mp != M:
        a = jnp.pad(a, ((0, Mp - M), (0, 0)))
        if residual is not None:
            residual = jnp.pad(residual, ((0, Mp - M), (0, 0)))
    TM = min(512, Mp)                 # single-K block; fits v7x 64 MiB VMEM too
    TN = _pick_tn(N)
    ni, nj = _cdiv(Mp, TM), _cdiv(N, TN)

    s2 = scale.reshape(1, N).astype(jnp.float32)
    t2 = shift.reshape(1, N).astype(jnp.float32)

    has_res = residual is not None
    inputs = [a, b, s2, t2]
    in_specs = [
        pl.BlockSpec((TM, K), lambda j, i: (i, 0)),     # A: full-K block
        pl.BlockSpec((K, TN), lambda j, i: (0, j)),     # B resident across inner i
        pl.BlockSpec((1, TN), lambda j, i: (0, j)),
        pl.BlockSpec((1, TN), lambda j, i: (0, j)),
    ]
    if has_res:
        inputs.append(residual)
        in_specs.append(pl.BlockSpec((TM, TN), lambda j, i: (i, j)))

    out = pl.pallas_call(
        functools.partial(_mm_kernel, act=act, has_res=has_res),
        out_shape=jax.ShapeDtypeStruct((Mp, N), out_dtype),
        grid=(nj, ni),                    # Cout tiles outer -> weight-stationary
        in_specs=in_specs,
        out_specs=pl.BlockSpec((TM, TN), lambda j, i: (i, j)),
        compiler_params=pltpu.CompilerParams(
            dimension_semantics=("parallel", "parallel"),
            vmem_limit_bytes=_VMEM_LIMIT),
    )(*inputs)
    return out[:M] if Mp != M else out


# --------------------------------------------------------------------------
# Implicit-GEMM convolution wrappers
# --------------------------------------------------------------------------
def _space_to_depth2(x):
    """(N, H, W, C) with H, W even -> (N, H/2, W/2, 4C), channel order (sy, sx, c)."""
    n, h, w, c = x.shape
    x = x.reshape(n, h // 2, 2, w // 2, 2, c)
    x = jnp.transpose(x, (0, 1, 3, 2, 4, 5))
    return x.reshape(n, h // 2, w // 2, 4 * c)


def _weight_to_s2d(w, k, kb):
    """(Cout, Cin, k, k) stride-2 weight -> (kb, kb, 4*Cin, Cout) stride-1 weight
    on the 2x2 space-to-depth grid (unused slots are zero)."""
    cout, cin = w.shape[:2]
    wt = jnp.transpose(w, (2, 3, 1, 0))                      # (k, k, cin, cout)
    w2 = jnp.zeros((kb, 2, kb, 2, cin, cout), w.dtype)
    for dy in range(k):
        for dx in range(k):
            w2 = w2.at[dy // 2, dy % 2, dx // 2, dx % 2].set(wt[dy, dx])
    w2 = jnp.transpose(w2, (0, 2, 1, 3, 4, 5))               # (bdy, bdx, sy, sx, cin, cout)
    return w2.reshape(kb, kb, 4 * cin, cout)


def _conv_s1_igemm_bn_relu(xpad, w4, scale, shift, kh, kw):
    """Stride-1 kh x kw conv (spatial padding already applied) + folded BN + ReLU.

    xpad: (N, Hpad, Wpad0, Cin) NHWC, w4: (kh, kw, Cin, Cout).
    """
    n, hpad, wpad0, cin = xpad.shape
    cout = w4.shape[-1]
    hout = hpad - kh + 1
    wout = wpad0 - kw + 1
    pw = _round_up(wout, 8)                          # flattened 8-aligned row pitch
    extra = pw + kw - 1 - wpad0
    if extra > 0:
        xpad = jnp.pad(xpad, ((0, 0), (0, 0), (0, extra), (0, 0)))
    # kw-concatenated channels: xcat[h, w, dx*cin + c] = xpad[h, w + dx, c]
    xcat = jnp.concatenate([xpad[:, :, dx:dx + pw, :] for dx in range(kw)], axis=-1)
    kcat = kw * cin
    xflat = xcat.reshape(n, hpad * pw, kcat).astype(_COMPUTE_DTYPE)
    wmat = w4.reshape(kh * kcat, cout).astype(_COMPUTE_DTYPE)
    s2 = scale.reshape(1, cout).astype(jnp.float32)
    t2 = shift.reshape(1, cout).astype(jnp.float32)

    tn = _pick_tn(cout)
    nj = _cdiv(cout, tn)
    cap = max(1, _ACC_BUDGET // (pw * tn * 4))       # bound the f32 accumulator
    tr = _largest_divisor(hout, cap)
    nr = hout // tr

    kernel = functools.partial(_igemm_kernel, kh=kh, kcat=kcat, pw=pw, tr=tr, wout=wout)
    return pl.pallas_call(
        kernel,
        out_shape=jax.ShapeDtypeStruct((n, hout, wout, cout), _COMPUTE_DTYPE),
        grid=(n, nj, nr),                            # image, Cout tile, row tile
        in_specs=[
            pl.BlockSpec((1, hpad * pw, kcat), lambda b, j, r: (b, 0, 0)),  # resident
            pl.BlockSpec((kh * kcat, tn), lambda b, j, r: (0, j)),
            pl.BlockSpec((1, tn), lambda b, j, r: (0, j)),
            pl.BlockSpec((1, tn), lambda b, j, r: (0, j)),
        ],
        out_specs=pl.BlockSpec((1, tr, wout, tn), lambda b, j, r: (b, r, 0, j)),
        compiler_params=pltpu.CompilerParams(
            dimension_semantics=("parallel", "parallel", "parallel"),
            vmem_limit_bytes=_VMEM_LIMIT),
    )(xflat, wmat, s2, t2)


@jax.jit
def stem_conv7x7_s2_bn_relu(x, w, scale, shift):
    """7x7 / stride-2 / pad-3 stem conv: 2x2 space-to-depth -> 4x4 stride-1 implicit GEMM."""
    xp = jnp.pad(x.astype(_COMPUTE_DTYPE), ((0, 0), (3, 3), (3, 3), (0, 0)))
    xs = _space_to_depth2(xp)                        # requires even H, W (ResNet inputs)
    w4 = _weight_to_s2d(w, 7, 4)
    return _conv_s1_igemm_bn_relu(xs, w4, scale, shift, 4, 4)


@functools.partial(jax.jit, static_argnames=("stride",))
def conv3x3_bn_relu(x, w, scale, shift, *, stride):
    """3x3 conv (stride 1 or 2, pad 1) + folded BN + ReLU via implicit GEMM."""
    xp = jnp.pad(x.astype(_COMPUTE_DTYPE), ((0, 0), (1, 1), (1, 1), (0, 0)))
    if stride == 1:
        w4 = jnp.transpose(w, (2, 3, 1, 0))          # (3, 3, Cin, Cout)
        return _conv_s1_igemm_bn_relu(xp, w4, scale, shift, 3, 3)
    # stride 2: space-to-depth turns it into a 2x2 stride-1 conv over 4*Cin channels
    xs = _space_to_depth2(xp)
    w4 = _weight_to_s2d(w, 3, 2)
    return _conv_s1_igemm_bn_relu(xs, w4, scale, shift, 2, 2)


@functools.partial(jax.jit, static_argnames=("stride", "act"))
def conv1x1_bn_act(x, w, scale, shift, residual=None, *, stride, act):
    """1x1 conv (bias=False) + folded BN + optional residual + activation (fused matmul)."""
    cin = x.shape[-1]
    cout = w.shape[0]
    xb = x.astype(_COMPUTE_DTYPE)
    if stride > 1:
        xb = xb[:, ::stride, ::stride, :]
    n, ho, wo, _ = xb.shape
    patches = xb.reshape(n * ho * wo, cin)
    wmat = w.reshape(cout, cin).T.astype(_COMPUTE_DTYPE)
    res = None
    if residual is not None:
        res = residual.astype(_COMPUTE_DTYPE).reshape(n * ho * wo, cout)
    out = matmul_scale_act(patches, wmat, scale, shift, res, act, _COMPUTE_DTYPE)
    return out.reshape(n, ho, wo, cout)


@jax.jit
def maxpool2d_3x3_s2(x):
    """3x3 / stride-2 / pad-1 max pool, read-once Pallas kernel."""
    n, h, w, c = x.shape
    ho = (h - 1) // 2 + 1
    wo = (w - 1) // 2 + 1
    w1 = _round_up(wo + 1, 8)                        # packed (column-pair) row pitch
    hp = 2 * ho + 1
    xp = jnp.pad(x, ((0, 0), (1, hp - h - 1), (1, 2 * w1 - w - 1), (0, 0)),
                 constant_values=-jnp.inf)
    xf = xp.reshape(n, hp * w1, 2 * c)               # free view: packs column pairs
    tr = _largest_divisor(ho, 16)
    return pl.pallas_call(
        functools.partial(_maxpool_kernel, w1=w1, wout=wo, tr=tr),
        out_shape=jax.ShapeDtypeStruct((n, ho, wo, c), x.dtype),
        grid=(n, ho // tr),
        in_specs=[pl.BlockSpec((1, hp * w1, 2 * c), lambda b, r: (b, 0, 0))],
        out_specs=pl.BlockSpec((1, tr, wo, c), lambda b, r: (b, r, 0, 0)),
        compiler_params=pltpu.CompilerParams(
            dimension_semantics=("parallel", "parallel"),
            vmem_limit_bytes=_VMEM_LIMIT),
    )(xf)


@jax.jit
def avgpool_fc_sigmoid(x, fc_w, fc_b):
    pooled = jnp.mean(x.astype(jnp.float32), axis=(1, 2))      # AdaptiveAvgPool2d((1,1))
    nc = fc_b.shape[0]
    return matmul_scale_act(pooled.astype(_COMPUTE_DTYPE),
                            jnp.transpose(fc_w).astype(_COMPUTE_DTYPE),
                            jnp.ones((nc,), jnp.float32),
                            fc_b.astype(jnp.float32),
                            None, "sigmoid", jnp.float32)


# --------------------------------------------------------------------------
# Parameters (deterministic init mirroring the torch module shapes)
# --------------------------------------------------------------------------
def _kaiming_conv(key, cout, cin, kh, kw):
    fan_out = cout * kh * kw                       # kaiming_normal_, mode='fan_out'
    std = math.sqrt(2.0 / fan_out)
    return jax.random.normal(key, (cout, cin, kh, kw), jnp.float32) * std


def _bn_fold(c):
    gamma = jnp.ones((c,), jnp.float32)
    beta = jnp.zeros((c,), jnp.float32)
    running_mean = jnp.zeros((c,), jnp.float32)
    running_var = jnp.ones((c,), jnp.float32)
    scale = gamma / jnp.sqrt(running_var + BN_EPS)
    shift = beta - running_mean * scale
    return scale, shift


def init_params(key, num_classes=1000):
    keys = iter(jax.random.split(key, 64))
    params = {
        "conv1_w": _kaiming_conv(next(keys), 64, 3, 7, 7),
        "bn1": _bn_fold(64),
    }
    # (cin_block0, mid, cout, conv2_stride_block0, downsample_stride, num_blocks)
    stage_cfgs = [
        (64,   64,  256, 1, 1, 3),   # conv_2_x
        (256, 128,  512, 2, 2, 4),   # conv_3_x
        (512, 256, 1024, 2, 2, 6),   # conv_4_x
        (1024, 512, 2048, 2, 2, 3),  # conv_5_x
    ]
    stages = []
    for cin0, mid, cout, s2_0, ds_s, nblocks in stage_cfgs:
        blocks = []
        for b in range(nblocks):
            cin = cin0 if b == 0 else cout
            s2 = s2_0 if b == 0 else 1
            blk = {
                "w1": _kaiming_conv(next(keys), mid, cin, 1, 1), "bn1": _bn_fold(mid), "s1": 1,
                "w2": _kaiming_conv(next(keys), mid, mid, 3, 3), "bn2": _bn_fold(mid), "s2": s2,
                "w3": _kaiming_conv(next(keys), cout, mid, 1, 1), "bn3": _bn_fold(cout),
            }
            if b == 0:  # shortcut: Conv2d(cin0 -> cout, k=1, stride=ds_s) + BN
                blk["wd"] = _kaiming_conv(next(keys), cout, cin0, 1, 1)
                blk["bnd"] = _bn_fold(cout)
                blk["sd"] = ds_s
            blocks.append(blk)
        stages.append(blocks)
    params["stages"] = stages

    bound = 1.0 / math.sqrt(2048.0)                # nn.Linear default init
    params["fc_w"] = jax.random.uniform(next(keys), (num_classes, 2048),
                                        jnp.float32, -bound, bound)
    params["fc_b"] = jax.random.uniform(next(keys), (num_classes,),
                                        jnp.float32, -bound, bound)
    return params


# --------------------------------------------------------------------------
# Forward pass
# --------------------------------------------------------------------------
def _residual_block(x, p):
    identity = x
    out = conv1x1_bn_act(x, p["w1"], p["bn1"][0], p["bn1"][1],
                         stride=p["s1"], act="relu")
    out = conv3x3_bn_relu(out, p["w2"], p["bn2"][0], p["bn2"][1], stride=p["s2"])
    if "wd" in p:
        residual = conv1x1_bn_act(identity, p["wd"], p["bnd"][0], p["bnd"][1],
                                  stride=p["sd"], act="none")
    else:
        residual = identity
    # last 1x1 conv with fused BN + residual add + ReLU
    return conv1x1_bn_act(out, p["w3"], p["bn3"][0], p["bn3"][1], residual,
                          stride=1, act="relu")


def resnet50_forward(params, x_nchw):
    x = jnp.transpose(x_nchw, (0, 2, 3, 1))                           # NCHW -> NHWC
    # conv_1: 7x7/2 conv + BN + ReLU + 3x3/2 maxpool
    x = stem_conv7x7_s2_bn_relu(x, params["conv1_w"], params["bn1"][0], params["bn1"][1])
    x = maxpool2d_3x3_s2(x)
    # conv_2_x .. conv_5_x
    for stage in params["stages"]:
        for blk in stage:
            x = _residual_block(x, blk)
    # AdaptiveAvgPool2d((1,1)) + fc + sigmoid (fused into the Pallas matmul epilogue)
    return avgpool_fc_sigmoid(x, params["fc_w"], params["fc_b"])


# --------------------------------------------------------------------------
if __name__ == "__main__":
    key = jax.random.PRNGKey(0)
    kx, kp = jax.random.split(key)
    # small but architecture-consistent input: final feature map is 1x1x2048
    x = jax.random.normal(kx, (2, 3, 32, 32), jnp.float32)            # NCHW
    params = init_params(kp, num_classes=1000)
    out = resnet50_forward(params, x)
    out = jax.block_until_ready(out)
    assert out.shape == (2, 1000)
    assert bool(jnp.all(jnp.isfinite(out)))
    assert bool(jnp.all((out >= 0.0) & (out <= 1.0)))                 # sigmoid output
    print("KERNEL_OK")
</pallas_src>

<mosaic_0001>
module attributes {stable_mosaic.version = 11 : i64} {
  func.func @_igemm_kernel(%arg0: i32, %arg1: i32, %arg2: i32, %arg3: memref<1x304x48xbf16, #tpu.memory_space<vmem>>, %arg4: memref<192x64xbf16, #tpu.memory_space<vmem>>, %arg5: memref<1x64xf32, #tpu.memory_space<vmem>>, %arg6: memref<1x64xf32, #tpu.memory_space<vmem>>, %arg7: memref<1x16x16x64xbf16, #tpu.memory_space<vmem>>) attributes {dimension_semantics = [#tpu.dimension_semantics<parallel>, #tpu.dimension_semantics<parallel>, #tpu.dimension_semantics<parallel>], iteration_bounds = array<i64: 2, 1, 1>, scalar_prefetch = 0 : i64, scratch_operands = 0 : i64, tpu.core_type = #tpu.core_type<tc>, window_params = [{transform_indices = @transform_0, window_bounds = array<i64: 1, 304, 48>}, {transform_indices = @transform_1, window_bounds = array<i64: 192, 64>}, {transform_indices = @transform_2, window_bounds = array<i64: 1, 64>}, {transform_indices = @transform_3, window_bounds = array<i64: 1, 64>}, {transform_indices = @transform_4, window_bounds = array<i64: 1, 16, 16, 64>}]} {
    %c256_i32 = arith.constant 256 : i32
    %0 = arith.muli %arg2, %c256_i32 : i32
    %c0_i32 = arith.constant 0 : i32
    %1 = arith.addi %0, %c0_i32 : i32
    %2 = tpu.assume_multiple %1, 8 : i32
    %c0 = arith.constant 0 : index
    %3 = arith.index_cast %2 : i32 to index
    %c0_0 = arith.constant 0 : index
    %4 = vector.load %arg3[%c0, %3, %c0_0] : memref<1x304x48xbf16, #tpu.memory_space<vmem>>, vector<1x256x48xbf16>
    %5 = vector.shape_cast %4 : vector<1x256x48xbf16> to vector<256x48xbf16>
    %c0_1 = arith.constant 0 : index
    %c0_2 = arith.constant 0 : index
    %6 = vector.load %arg4[%c0_1, %c0_2] : memref<192x64xbf16, #tpu.memory_space<vmem>>, vector<48x64xbf16>
    %cst = arith.constant dense<0.000000e+00> : vector<256x64xf32>
    %7 = tpu.matmul %5, %6, %cst {dimension_numbers = #tpu.dot_dimension_numbers<[1], [0], [0], [1], [0, 0, 1, 1], [], []>} : vector<256x48xbf16>, vector<48x64xbf16>, vector<256x64xf32> -> vector<256x64xf32>
    %c16_i32 = arith.constant 16 : i32
    %8 = arith.addi %0, %c16_i32 : i32
    %9 = tpu.assume_multiple %8, 8 : i32
    %c0_3 = arith.constant 0 : index
    %10 = arith.index_cast %9 : i32 to index
    %c0_4 = arith.constant 0 : index
    %11 = vector.load %arg3[%c0_3, %10, %c0_4] : memref<1x304x48xbf16, #tpu.memory_space<vmem>>, vector<1x256x48xbf16>
    %12 = vector.shape_cast %11 : vector<1x256x48xbf16> to vector<256x48xbf16>
    %c48 = arith.constant 48 : index
    %c0_5 = arith.constant 0 : index
    %13 = vector.load %arg4[%c48, %c0_5] : memref<192x64xbf16, #tpu.memory_space<vmem>>, vector<48x64xbf16>
    %cst_6 = arith.constant dense<0.000000e+00> : vector<256x64xf32>
    %14 = tpu.matmul %12, %13, %cst_6 {dimension_numbers = #tpu.dot_dimension_numbers<[1], [0], [0], [1], [0, 0, 1, 1], [], []>} : vector<256x48xbf16>, vector<48x64xbf16>, vector<256x64xf32> -> vector<256x64xf32>
    %15 = arith.addf %7, %14 : vector<256x64xf32>
    %c32_i32 = arith.constant 32 : i32
    %16 = arith.addi %0, %c32_i32 : i32
    %17 = tpu.assume_multiple %16, 8 : i32
    %c0_7 = arith.constant 0 : index
    %18 = arith.index_cast %17 : i32 to index
    %c0_8 = arith.constant 0 : index
    %19 = vector.load %arg3[%c0_7, %18, %c0_8] : memref<1x304x48xbf16, #tpu.memory_space<vmem>>, vector<1x256x48xbf16>
    %20 = vector.shape_cast %19 : vector<1x256x48xbf16> to vector<256x48xbf16>
    %c96 = arith.constant 96 : index
    %c0_9 = arith.constant 0 : index
    %21 = vector.load %arg4[%c96, %c0_9] : memref<192x64xbf16, #tpu.memory_space<vmem>>, vector<48x64xbf16>
    %cst_10 = arith.constant dense<0.000000e+00> : vector<256x64xf32>
    %22 = tpu.matmul %20, %21, %cst_10 {dimension_numbers = #tpu.dot_dimension_numbers<[1], [0], [0], [1], [0, 0, 1, 1], [], []>} : vector<256x48xbf16>, vector<48x64xbf16>, vector<256x64xf32> -> vector<256x64xf32>
    %23 = arith.addf %15, %22 : vector<256x64xf32>
    %c48_i32 = arith.constant 48 : i32
    %24 = arith.addi %0, %c48_i32 : i32
    %25 = tpu.assume_multiple %24, 8 : i32
    %c0_11 = arith.constant 0 : index
    %26 = arith.index_cast %25 : i32 to index
    %c0_12 = arith.constant 0 : index
    %27 = vector.load %arg3[%c0_11, %26, %c0_12] : memref<1x304x48xbf16, #tpu.memory_space<vmem>>, vector<1x256x48xbf16>
    %28 = vector.shape_cast %27 : vector<1x256x48xbf16> to vector<256x48xbf16>
    %c144 = arith.constant 144 : index
    %c0_13 = arith.constant 0 : index
    %29 = vector.load %arg4[%c144, %c0_13] : memref<192x64xbf16, #tpu.memory_space<vmem>>, vector<48x64xbf16>
    %cst_14 = arith.constant dense<0.000000e+00> : vector<256x64xf32>
    %30 = tpu.matmul %28, %29, %cst_14 {dimension_numbers = #tpu.dot_dimension_numbers<[1], [0], [0], [1], [0, 0, 1, 1], [], []>} : vector<256x48xbf16>, vector<48x64xbf16>, vector<256x64xf32> -> vector<256x64xf32>
    %31 = arith.addf %23, %30 : vector<256x64xf32>
    %c0_15 = arith.constant 0 : index
    %c0_16 = arith.constant 0 : index
    %32 = vector.load %arg5[%c0_15, %c0_16] : memref<1x64xf32, #tpu.memory_space<vmem>>, vector<1x64xf32>
    %33 = vector.broadcast %32 : vector<1x64xf32> to vector<256x64xf32>
    %34 = arith.mulf %31, %33 : vector<256x64xf32>
    %c0_17 = arith.constant 0 : index
    %c0_18 = arith.constant 0 : index
    %35 = vector.load %arg6[%c0_17, %c0_18] : memref<1x64xf32, #tpu.memory_space<vmem>>, vector<1x64xf32>
    %36 = vector.broadcast %35 : vector<1x64xf32> to vector<256x64xf32>
    %37 = arith.addf %34, %36 : vector<256x64xf32>
    %cst_19 = arith.constant 0.000000e+00 : f32
    %38 = vector.broadcast %cst_19 : f32 to vector<256x64xf32>
    %39 = arith.maximumf %37, %38 : vector<256x64xf32>
    %40 = arith.truncf %39 : vector<256x64xf32> to vector<256x64xbf16>
    %41 = vector.extract_strided_slice %40 {offsets = [0, 0], sizes = [16, 64], strides = [1, 1]} : vector<256x64xbf16> to vector<16x64xbf16>
    %c0_20 = arith.constant 0 : index
    %c0_21 = arith.constant 0 : index
    %c0_22 = arith.constant 0 : index
    %c0_23 = arith.constant 0 : index
    %42 = vector.load %arg7[%c0_20, %c0_21, %c0_22, %c0_23] : memref<1x16x16x64xbf16, #tpu.memory_space<vmem>>, vector<1x1x16x64xbf16>
    %43 = vector.shape_cast %42 : vector<1x1x16x64xbf16> to vector<16x64xbf16>
    %44 = vector.shape_cast %41 : vector<16x64xbf16> to vector<1x1x16x64xbf16>
    tpu.vector_store %arg7[%c0_20, %c0_21, %c0_22, %c0_23], %44 {strides = array<i32>} : memref<1x16x16x64xbf16, #tpu.memory_space<vmem>>, vector<1x1x16x64xbf16>,
    %45 = vector.extract_strided_slice %40 {offsets = [16, 0], sizes = [16, 64], strides = [1, 1]} : vector<256x64xbf16> to vector<16x64xbf16>
    %c0_24 = arith.constant 0 : index
    %c1 = arith.constant 1 : index
    %c0_25 = arith.constant 0 : index
    %c0_26 = arith.constant 0 : index
    %46 = vector.load %arg7[%c0_24, %c1, %c0_25, %c0_26] : memref<1x16x16x64xbf16, #tpu.memory_space<vmem>>, vector<1x1x16x64xbf16>
    %47 = vector.shape_cast %46 : vector<1x1x16x64xbf16> to vector<16x64xbf16>
    %48 = vector.shape_cast %45 : vector<16x64xbf16> to vector<1x1x16x64xbf16>
    tpu.vector_store %arg7[%c0_24, %c1, %c0_25, %c0_26], %48 {strides = array<i32>} : memref<1x16x16x64xbf16, #tpu.memory_space<vmem>>, vector<1x1x16x64xbf16>,
    %49 = vector.extract_strided_slice %40 {offsets = [32, 0], sizes = [16, 64], strides = [1, 1]} : vector<256x64xbf16> to vector<16x64xbf16>
    %c0_27 = arith.constant 0 : index
    %c2 = arith.constant 2 : index
    %c0_28 = arith.constant 0 : index
    %c0_29 = arith.constant 0 : index
    %50 = vector.load %arg7[%c0_27, %c2, %c0_28, %c0_29] : memref<1x16x16x64xbf16, #tpu.memory_space<vmem>>, vector<1x1x16x64xbf16>
    %51 = vector.shape_cast %50 : vector<1x1x16x64xbf16> to vector<16x64xbf16>
    %52 = vector.shape_cast %49 : vector<16x64xbf16> to vector<1x1x16x64xbf16>
    tpu.vector_store %arg7[%c0_27, %c2, %c0_28, %c0_29], %52 {strides = array<i32>} : memref<1x16x16x64xbf16, #tpu.memory_space<vmem>>, vector<1x1x16x64xbf16>,
    %53 = vector.extract_strided_slice %40 {offsets = [48, 0], sizes = [16, 64], strides = [1, 1]} : vector<256x64xbf16> to vector<16x64xbf16>
    %c0_30 = arith.constant 0 : index
    %c3 = arith.constant 3 : index
    %c0_31 = arith.constant 0 : index
    %c0_32 = arith.constant 0 : index
    %54 = vector.load %arg7[%c0_30, %c3, %c0_31, %c0_32] : memref<1x16x16x64xbf16, #tpu.memory_space<vmem>>, vector<1x1x16x64xbf16>
    %55 = vector.shape_cast %54 : vector<1x1x16x64xbf16> to vector<16x64xbf16>
    %56 = vector.shape_cast %53 : vector<16x64xbf16> to vector<1x1x16x64xbf16>
    tpu.vector_store %arg7[%c0_30, %c3, %c0_31, %c0_32], %56 {strides = array<i32>} : memref<1x16x16x64xbf16, #tpu.memory_space<vmem>>, vector<1x1x16x64xbf16>,
    %57 = vector.extract_strided_slice %40 {offsets = [64, 0], sizes = [16, 64], strides = [1, 1]} : vector<256x64xbf16> to vector<16x64xbf16>
    %c0_33 = arith.constant 0 : index
    %c4 = arith.constant 4 : index
    %c0_34 = arith.constant 0 : index
    %c0_35 = arith.constant 0 : index
    %58 = vector.load %arg7[%c0_33, %c4, %c0_34, %c0_35] : memref<1x16x16x64xbf16, #tpu.memory_space<vmem>>, vector<1x1x16x64xbf16>
    %59 = vector.shape_cast %58 : vector<1x1x16x64xbf16> to vector<16x64xbf16>
    %60 = vector.shape_cast %57 : vector<16x64xbf16> to vector<1x1x16x64xbf16>
    tpu.vector_store %arg7[%c0_33, %c4, %c0_34, %c0_35], %60 {strides = array<i32>} : memref<1x16x16x64xbf16, #tpu.memory_space<vmem>>, vector<1x1x16x64xbf16>,
    %61 = vector.extract_strided_slice %40 {offsets = [80, 0], sizes = [16, 64], strides = [1, 1]} : vector<256x64xbf16> to vector<16x64xbf16>
    %c0_36 = arith.constant 0 : index
    %c5 = arith.constant 5 : index
    %c0_37 = arith.constant 0 : index
    %c0_38 = arith.constant 0 : index
    %62 = vector.load %arg7[%c0_36, %c5, %c0_37, %c0_38] : memref<1x16x16x64xbf16, #tpu.memory_space<vmem>>, vector<1x1x16x64xbf16>
    %63 = vector.shape_cast %62 : vector<1x1x16x64xbf16> to vector<16x64xbf16>
    %64 = vector.shape_cast %61 : vector<16x64xbf16> to vector<1x1x16x64xbf16>
    tpu.vector_store %arg7[%c0_36, %c5, %c0_37, %c0_38], %64 {strides = array<i32>} : memref<1x16x16x64xbf16, #tpu.memory_space<vmem>>, vector<1x1x16x64xbf16>,
    %65 = vector.extract_strided_slice %40 {offsets = [96, 0], sizes = [16, 64], strides = [1, 1]} : vector<256x64xbf16> to vector<16x64xbf16>
    %c0_39 = arith.constant 0 : index
    %c6 = arith.constant 6 : index
    %c0_40 = arith.constant 0 : index
    %c0_41 = arith.constant 0 : index
    %66 = vector.load %arg7[%c0_39, %c6, %c0_40, %c0_41] : memref<1x16x16x64xbf16, #tpu.memory_space<vmem>>, vector<1x1x16x64xbf16>
    %67 = vector.shape_cast %66 : vector<1x1x16x64xbf16> to vector<16x64xbf16>
    %68 = vector.shape_cast %65 : vector<16x64xbf16> to vector<1x1x16x64xbf16>
    tpu.vector_store %arg7[%c0_39, %c6, %c0_40, %c0_41], %68 {strides = array<i32>} : memref<1x16x16x64xbf16, #tpu.memory_space<vmem>>, vector<1x1x16x64xbf16>,
    %69 = vector.extract_strided_slice %40 {offsets = [112, 0], sizes = [16, 64], strides = [1, 1]} : vector<256x64xbf16> to vector<16x64xbf16>
    %c0_42 = arith.constant 0 : index
    %c7 = arith.constant 7 : index
    %c0_43 = arith.constant 0 : index
    %c0_44 = arith.constant 0 : index
    %70 = vector.load %arg7[%c0_42, %c7, %c0_43, %c0_44] : memref<1x16x16x64xbf16, #tpu.memory_space<vmem>>, vector<1x1x16x64xbf16>
    %71 = vector.shape_cast %70 : vector<1x1x16x64xbf16> to vector<16x64xbf16>
    %72 = vector.shape_cast %69 : vector<16x64xbf16> to vector<1x1x16x64xbf16>
    tpu.vector_store %arg7[%c0_42, %c7, %c0_43, %c0_44], %72 {strides = array<i32>} : memref<1x16x16x64xbf16, #tpu.memory_space<vmem>>, vector<1x1x16x64xbf16>,
    %73 = vector.extract_strided_slice %40 {offsets = [128, 0], sizes = [16, 64], strides = [1, 1]} : vector<256x64xbf16> to vector<16x64xbf16>
    %c0_45 = arith.constant 0 : index
    %c8 = arith.constant 8 : index
    %c0_46 = arith.constant 0 : index
    %c0_47 = arith.constant 0 : index
    %74 = vector.load %arg7[%c0_45, %c8, %c0_46, %c0_47] : memref<1x16x16x64xbf16, #tpu.memory_space<vmem>>, vector<1x1x16x64xbf16>
    %75 = vector.shape_cast %74 : vector<1x1x16x64xbf16> to vector<16x64xbf16>
    %76 = vector.shape_cast %73 : vector<16x64xbf16> to vector<1x1x16x64xbf16>
    tpu.vector_store %arg7[%c0_45, %c8, %c0_46, %c0_47], %76 {strides = array<i32>} : memref<1x16x16x64xbf16, #tpu.memory_space<vmem>>, vector<1x1x16x64xbf16>,
    %77 = vector.extract_strided_slice %40 {offsets = [144, 0], sizes = [16, 64], strides = [1, 1]} : vector<256x64xbf16> to vector<16x64xbf16>
    %c0_48 = arith.constant 0 : index
    %c9 = arith.constant 9 : index
    %c0_49 = arith.constant 0 : index
    %c0_50 = arith.constant 0 : index
    %78 = vector.load %arg7[%c0_48, %c9, %c0_49, %c0_50] : memref<1x16x16x64xbf16, #tpu.memory_space<vmem>>, vector<1x1x16x64xbf16>
    %79 = vector.shape_cast %78 : vector<1x1x16x64xbf16> to vector<16x64xbf16>
    %80 = vector.shape_cast %77 : vector<16x64xbf16> to vector<1x1x16x64xbf16>
    tpu.vector_store %arg7[%c0_48, %c9, %c0_49, %c0_50], %80 {strides = array<i32>} : memref<1x16x16x64xbf16, #tpu.memory_space<vmem>>, vector<1x1x16x64xbf16>,
    %81 = vector.extract_strided_slice %40 {offsets = [160, 0], sizes = [16, 64], strides = [1, 1]} : vector<256x64xbf16> to vector<16x64xbf16>
    %c0_51 = arith.constant 0 : index
    %c10 = arith.constant 10 : index
    %c0_52 = arith.constant 0 : index
    %c0_53 = arith.constant 0 : index
    %82 = vector.load %arg7[%c0_51, %c10, %c0_52, %c0_53] : memref<1x16x16x64xbf16, #tpu.memory_space<vmem>>, vector<1x1x16x64xbf16>
    %83 = vector.shape_cast %82 : vector<1x1x16x64xbf16> to vector<16x64xbf16>
    %84 = vector.shape_cast %81 : vector<16x64xbf16> to vector<1x1x16x64xbf16>
    tpu.vector_store %arg7[%c0_51, %c10, %c0_52, %c0_53], %84 {strides = array<i32>} : memref<1x16x16x64xbf16, #tpu.memory_space<vmem>>, vector<1x1x16x64xbf16>,
    %85 = vector.extract_strided_slice %40 {offsets = [176, 0], sizes = [16, 64], strides = [1, 1]} : vector<256x64xbf16> to vector<16x64xbf16>
    %c0_54 = arith.constant 0 : index
    %c11 = arith.constant 11 : index
    %c0_55 = arith.constant 0 : index
    %c0_56 = arith.constant 0 : index
    %86 = vector.load %arg7[%c0_54, %c11, %c0_55, %c0_56] : memref<1x16x16x64xbf16, #tpu.memory_space<vmem>>, vector<1x1x16x64xbf16>
    %87 = vector.shape_cast %86 : vector<1x1x16x64xbf16> to vector<16x64xbf16>
    %88 = vector.shape_cast %85 : vector<16x64xbf16> to vector<1x1x16x64xbf16>
    tpu.vector_store %arg7[%c0_54, %c11, %c0_55, %c0_56], %88 {strides = array<i32>} : memref<1x16x16x64xbf16, #tpu.memory_space<vmem>>, vector<1x1x16x64xbf16>,
    %89 = vector.extract_strided_slice %40 {offsets = [192, 0], sizes = [16, 64], strides = [1, 1]} : vector<256x64xbf16> to vector<16x64xbf16>
    %c0_57 = arith.constant 0 : index
    %c12 = arith.constant 12 : index
    %c0_58 = arith.constant 0 : index
    %c0_59 = arith.constant 0 : index
    %90 = vector.load %arg7[%c0_57, %c12, %c0_58, %c0_59] : memref<1x16x16x64xbf16, #tpu.memory_space<vmem>>, vector<1x1x16x64xbf16>
    %91 = vector.shape_cast %90 : vector<1x1x16x64xbf16> to vector<16x64xbf16>
    %92 = vector.shape_cast %89 : vector<16x64xbf16> to vector<1x1x16x64xbf16>
    tpu.vector_store %arg7[%c0_57, %c12, %c0_58, %c0_59], %92 {strides = array<i32>} : memref<1x16x16x64xbf16, #tpu.memory_space<vmem>>, vector<1x1x16x64xbf16>,
    %93 = vector.extract_strided_slice %40 {offsets = [208, 0], sizes = [16, 64], strides = [1, 1]} : vector<256x64xbf16> to vector<16x64xbf16>
    %c0_60 = arith.constant 0 : index
    %c13 = arith.constant 13 : index
    %c0_61 = arith.constant 0 : index
    %c0_62 = arith.constant 0 : index
    %94 = vector.load %arg7[%c0_60, %c13, %c0_61, %c0_62] : memref<1x16x16x64xbf16, #tpu.memory_space<vmem>>, vector<1x1x16x64xbf16>
    %95 = vector.shape_cast %94 : vector<1x1x16x64xbf16> to vector<16x64xbf16>
    %96 = vector.shape_cast %93 : vector<16x64xbf16> to vector<1x1x16x64xbf16>
    tpu.vector_store %arg7[%c0_60, %c13, %c0_61, %c0_62], %96 {strides = array<i32>} : memref<1x16x16x64xbf16, #tpu.memory_space<vmem>>, vector<1x1x16x64xbf16>,
    %97 = vector.extract_strided_slice %40 {offsets = [224, 0], sizes = [16, 64], strides = [1, 1]} : vector<256x64xbf16> to vector<16x64xbf16>
    %c0_63 = arith.constant 0 : index
    %c14 = arith.constant 14 : index
    %c0_64 = arith.constant 0 : index
    %c0_65 = arith.constant 0 : index
    %98 = vector.load %arg7[%c0_63, %c14, %c0_64, %c0_65] : memref<1x16x16x64xbf16, #tpu.memory_space<vmem>>, vector<1x1x16x64xbf16>
    %99 = vector.shape_cast %98 : vector<1x1x16x64xbf16> to vector<16x64xbf16>
    %100 = vector.shape_cast %97 : vector<16x64xbf16> to vector<1x1x16x64xbf16>
    tpu.vector_store %arg7[%c0_63, %c14, %c0_64, %c0_65], %100 {strides = array<i32>} : memref<1x16x16x64xbf16, #tpu.memory_space<vmem>>, vector<1x1x16x64xbf16>,
    %101 = vector.extract_strided_slice %40 {offsets = [240, 0], sizes = [16, 64], strides = [1, 1]} : vector<256x64xbf16> to vector<16x64xbf16>
    %c0_66 = arith.constant 0 : index
    %c15 = arith.constant 15 : index
    %c0_67 = arith.constant 0 : index
    %c0_68 = arith.constant 0 : index
    %102 = vector.load %arg7[%c0_66, %c15, %c0_67, %c0_68] : memref<1x16x16x64xbf16, #tpu.memory_space<vmem>>, vector<1x1x16x64xbf16>
    %103 = vector.shape_cast %102 : vector<1x1x16x64xbf16> to vector<16x64xbf16>
    %104 = vector.shape_cast %101 : vector<16x64xbf16> to vector<1x1x16x64xbf16>
    tpu.vector_store %arg7[%c0_66, %c15, %c0_67, %c0_68], %104 {strides = array<i32>} : memref<1x16x16x64xbf16, #tpu.memory_space<vmem>>, vector<1x1x16x64xbf16>,
    return
  }
  func.func @transform_0(%arg0: i32, %arg1: i32, %arg2: i32) -> (i32, i32, i32) {
    %c0_i32 = arith.constant 0 : i32
    %c0_i32_0 = arith.constant 0 : i32
    %c0_i32_1 = arith.constant 0 : i32
    return %arg0, %c0_i32, %c0_i32_0 : i32, i32, i32
  }
  func.func @transform_1(%arg0: i32, %arg1: i32, %arg2: i32) -> (i32, i32) {
    %c0_i32 = arith.constant 0 : i32
    %c0_i32_0 = arith.constant 0 : i32
    return %c0_i32, %arg1 : i32, i32
  }
  func.func @transform_2(%arg0: i32, %arg1: i32, %arg2: i32) -> (i32, i32) {
    %c0_i32 = arith.constant 0 : i32
    %c0_i32_0 = arith.constant 0 : i32
    return %c0_i32, %arg1 : i32, i32
  }
  func.func @transform_3(%arg0: i32, %arg1: i32, %arg2: i32) -> (i32, i32) {
    %c0_i32 = arith.constant 0 : i32
    %c0_i32_0 = arith.constant 0 : i32
    return %c0_i32, %arg1 : i32, i32
  }
  func.func @transform_4(%arg0: i32, %arg1: i32, %arg2: i32) -> (i32, i32, i32, i32) {
    %c0_i32 = arith.constant 0 : i32
    %c0_i32_0 = arith.constant 0 : i32
    return %arg0, %arg2, %c0_i32, %arg1 : i32, i32, i32, i32
  }
}

</mosaic_0001>

<bundles_post_ra>
// kernel: stem_conv7x7_s2_bn_relu.1
= control target key start
LH: loop header
LB: loop body
LE: loop exit
PB: predicated region body
PF: predicated region fallthrough
CT: control target
= control target key end

     0   :  { %9 = vsyncpa [#allocation3], 0  ;;  %s3499_s0 = inlined_call_operand.vmem [shape: bf16[2,304,48], index: 0, kind: input, shape index: {}]   ;;  %s3500_s1 = inlined_call_operand.vmem [shape: bf16[192,64], index: 1, kind: input, shape index: {}]   ;;  %s3501_s2 = inlined_call_operand.vmem [shape: f32[1,64], index: 2, kind: input, shape index: {}]   ;;  %s3502_s3 = inlined_call_operand.vmem [shape: f32[1,64], index: 3, kind: input, shape index: {}]   ;;  %s3503_s4 = inlined_call_operand.hbm [shape: bf16[2,16,16,64], index: 4, kind: output, shape index: {}]  }
   0x1   :  { %11 = vsyncpa [#allocation3 + $0x1], 0  ;;  %s3073_s15 = smov 0   ;;  %s3075_s16 = smov 0  }
   0x2   :  { %s3077_s17 = smov 0   ;;  %s3079_s18 = smov 0  }
   0x3   :  { %s3081_s19 = smov 0   ;;  %s3083_s20 = smov 0  }
   0x4 LB: > { %s2159_s21 = sadd.s32 4294967295, %s3043_s20   ;;  %s2160_s22 = sadd.s32 4294967294, %s3043_s20   ;;  %s3043_s20 = sphi %s3083_s20, %s17_s20   ;;  %s3039_s19 = sphi %s3081_s19, %s3510_s19   ;;  %s3035_s18 = sphi %s3079_s18, %s3509_s18   ;;  %s3031_s17 = sphi %s3077_s17, %s3508_s17   ;;  %s3027_s16 = sphi %s3075_s16, %s3507_s16   ;;  %s3023_s15 = sphi %s3073_s15, %s3506_s15  }
   0x5   : > { %s36_s23 = sadd.s32 1, %s3039_s19  ;;  %s151_s24 = sadd.s32 1, %s3031_s17 }
   0x6   : > { %p38_p0 = scmp.ge.s32.totalorder %s36_s23, 2  ;;  %p161_p1 = scmp.ne.s32.totalorder %s3031_s17, %s3027_s16 }
   0x7   : > { %p162_p2 = scmp.eq.s32.totalorder %s2159_s21, 1  ;;  %p167_p3 = scmp.ne.s32.totalorder %s3027_s16, %s3023_s15 }
   0x8   : > { %s3512_s23 = smov (%p38_p0, %s36_s23), 0  ;;  %p168_p5 = scmp.eq.s32.totalorder %s2160_s22, 1 }
   0x9   : > { %p3113_p4 = por %p162_p2, %p161_p1  ;;  %s144_s26 = ssub.s32 %s3039_s19, %s3512_s23 }
   0xa   : > { %p2166_p6 = scmp.ge.s32.totalorder %s3043_s20, 1  ;;  %p149_p7 = scmp.eq.s32.totalorder %s144_s26, 0 }
   0xb   : > { %p3120_p8 = por %p168_p5, %p167_p3  ;;  %p213_p9 = scmp.lt.s32.totalorder %s3043_s20, 3 }
   0xc   : > { %s3126_s28 = scalar_select %p149_p7, %s3031_s17, %s151_s24  }
   0xd   : > { %p214_p10 = pnand %p2166_p6, %p213_p9 }
   0xe   : > { %v2889_v0 = vld [vmem:[%s3500_s1 + $0x18] sm:$0xff] (!%p214_p10)   ;;  %p249_p11 = scmp.lt.s32.totalorder (!%p214_p10), %s3035_s18, 1  ;;  %v2890_v1 = vld [vmem:[%s3500_s1 + $0x30] sm:$0xff] (!%p214_p10)   ;;  %v2891_v2 = vld [vmem:[%s3500_s1 + $0x20] sm:$0xff] (!%p214_p10)   ;;  %vm450_vm0 = vcmask (!%p214_p10), 392192   ;;  %s246_s26 = sand.u32 (!%p214_p10), 1, %s3027_s16  }
   0xf   : > { %217 = sbr.rel (%p214_p10) target bundleno = 389 (0x185), region = 36  ;;  %2583 = vmatprep.subr.bf16.mxu1 (!%p214_p10), %v2889_v0  ;;  %2659 = vmatprep.subr.bf16.mxu0 (!%p214_p10), %v2890_v1  ;;  %v2892_v3 = vld [vmem:[%s3500_s1 + $0x38] sm:$0xff] (!%p214_p10)   ;;  %v2893_v4 = vld [vmem:[%s3500_s1 + $0x28] sm:$0xff] (!%p214_p10)   ;;  %v2894_v5 = vld [vmem:[%s3500_s1 + $0x40] sm:$0xff] (!%p214_p10)   ;;  %vm1864_vm1 = vcmask (!%p214_p10), 519168   ;;  %s2506_s7 = sshll.u32 (!%p214_p10), %s3035_s18, 11 }
  0x10   : > { %2584 = vmatpush3.bf16.msra.mxu1 (!%p214_p10), %v2889_v0  ;;  %2660 = vmatpush3.bf16.msra.mxu0 (!%p214_p10), %v2890_v1  ;;  %v2898_v6 = vld [vmem:[%s3500_s1] sm:$0xff] (!%p214_p10)   ;;  %v2900_v11 = vld [vmem:[%s3500_s1 + $0x48] sm:$0xff] (!%p214_p10)   ;;  %v2910_v19 = vld [vmem:[%s3500_s1 + $0x50] sm:$0xff] (!%p214_p10)   ;;  %s3441_s11 = scalar_lea.hbm (!%p214_p10), %s3503_s4, %s2506_s7  ;;  %s3045_s13 = smov (!%p214_p10), [#allocation2]  }
  0x11   : > { %2585 = vmatprep.subr.bf16.mxu1 (!%p214_p10), %v2891_v2  ;;  %2661 = vmatprep.subr.bf16.mxu0 (!%p214_p10), %v2892_v3  ;;  %v2909_v18 = vld [vmem:[%s3500_s1 + $0x8] sm:$0xff] (!%p214_p10)   ;;  %v2923_v27 = vld [vmem:[%s3500_s1 + $0x10] sm:$0xff] (!%p214_p10)   ;;  %v2924_v28 = vld [vmem:[%s3500_s1 + $0x58] sm:$0xff] (!%p214_p10)  }
  0x14   : > { %2586 = vmatpush3.bf16.msra.mxu1 (!%p214_p10), %v2891_v2  ;;  %2662 = vmatpush3.bf16.msra.mxu0 (!%p214_p10), %v2892_v3 }
  0x15   : > { %2587 = vmatprep.subr.bf16.mxu1 (!%p214_p10), %v2893_v4  ;;  %2663 = vmatprep.subr.bf16.mxu0 (!%p214_p10), %v2894_v5 }
  0x16   : > { %s250_s9 = scalar_select %p249_p11, %s3035_s18, 1 }
  0x17   : > { %s3453_s18 = scalar_lea.sflag [#allocation3], %s246_s26 }
  0x18   : > { %s2831_s14 = smul.u32 152, %s250_s9  ;;  %2588 = vmatpush3.bf16.msra.mxu1 %v2893_v4  ;;  %2664 = vmatpush3.bf16.msra.mxu0 %v2894_v5 }
  0x19   : > { %2621 = vmatprep.subr.bf16.mxu1 %v2898_v6  ;;  %2697 = vmatprep.subr.bf16.mxu0 %v2900_v11 }
  0x1a   : > { %s3151_s29 = scalar_lea.vmem %s3499_s0, %s2831_s14  ;;  %s2969_s14 = sshll.u32 %s3045_s13, 4  ;;  %s2970_s14 = int_to_ptr.vmem [resolvable:$false] %s2969_s14 }
  0x1b   : > { %v2895_v7 = vld [vmem:[%s3151_s29 + $0x8] sm:$0xff]   ;;  %v2896_v8 = vld [vmem:[%s3151_s29 + $0x10] sm:$0xff]   ;;  %v2899_v10 = vld [vmem:[%s3151_s29 + $0x18] sm:$0xff]   ;;  %s2971_s21 = scalar_lea.vmem %s2970_s14, 4096 }
  0x1c   : > { %2589 = vmatprep.mubr.msk.bf16.mxu1 %vm450_vm0, %v2895_v7  ;;  %v2897_v9 = vld [vmem:[%s3151_s29 + $0x10] sm:$0xff]   ;;  %2665 = vmatprep.mubr.msk.bf16.mxu0 %vm450_vm0, %v2896_v8  ;;  %v2901_v12 = vld [vmem:[%s3151_s29 + $0x18] sm:$0xff]   ;;  %v2902_v13 = vld [vmem:[%s3151_s29 + $0x20] sm:$0xff]  }
  0x1d   : > { %2590 = vmatmul.mubr.msk.bf16.vlgmr.msra.gmra.mrb[0].mxu1 %vm450_vm0, %v2897_v9  ;;  %2666 = vmatmul.mubr.msk.bf16.vlgmr.msra.gmra.mrb[0].mxu0 %vm450_vm0, %v2899_v10  ;;  %v2903_v14 = vld [vmem:[%s3151_s29 + $0x20] sm:$0xff]   ;;  %v2904_v15 = vld [vmem:[%s3151_s29 + $0x28] sm:$0xff]   ;;  %v2906_v17 = vld [vmem:[%s3151_s29 + $0x30] sm:$0xff]  }
  0x1e   : > { %2622 = vmatpush3.bf16.msra.mxu1 %v2898_v6  ;;  %2698 = vmatpush3.bf16.msra.mxu0 %v2900_v11  ;;  %v2905_v16 = vld [vmem:[%s3151_s29 + $0x28] sm:$0xff]   ;;  %v2907_v20 = vld [vmem:[%s3151_s29 + $0x30] sm:$0xff]   ;;  %v2908_v21 = vld [vmem:[%s3151_s29 + $0x38] sm:$0xff]  }
  0x1f   : > { %2593 = vmatprep.mubr.msk.bf16.mxu1 %vm450_vm0, %v2901_v12  ;;  %2669 = vmatprep.mubr.msk.bf16.mxu0 %vm450_vm0, %v2902_v13  ;;  %v2911_v22 = vld [vmem:[%s3151_s29 + $0x38] sm:$0xff]   ;;  %v2912_v23 = vld [vmem:[%s3151_s29 + $0x40] sm:$0xff]   ;;  %v2914_v25 = vld [vmem:[%s3151_s29 + $0x48] sm:$0xff]  }
  0x20   : > { %2623 = vmatprep.subr.bf16.mxu1 %v2909_v18  ;;  %2699 = vmatprep.subr.bf16.mxu0 %v2910_v19  ;;  %v2913_v24 = vld [vmem:[%s3151_s29 + $0x40] sm:$0xff]   ;;  %v2915_v26 = vld [vmem:[%s3151_s29 + $0x48] sm:$0xff]   ;;  %v2916_v29 = vld [vmem:[%s3151_s29 + $0x50] sm:$0xff]  }
  0x21   : > { %v2917_v30 = vld [vmem:[%s3151_s29 + $0x50] sm:$0xff]   ;;  %v2918_v31 = vld [vmem:[%s3151_s29 + $0x58] sm:$0xff]   ;;  %v2920_v33 = vld [vmem:[%s3151_s29 + $0x60] sm:$0xff]  }
  0x22   : > { %2624 = vmatpush3.bf16.msra.mxu1 %v2909_v18  ;;  %2700 = vmatpush3.bf16.msra.mxu0 %v2910_v19  ;;  %v2919_v32 = vld [vmem:[%s3151_s29 + $0x58] sm:$0xff]   ;;  %v2921_v34 = vld [vmem:[%s3151_s29 + $0x60] sm:$0xff]   ;;  %v2922_v35 = vld [vmem:[%s3151_s29 + $0x68] sm:$0xff]  }
  0x23   : > { %2625 = vmatprep.subr.bf16.mxu1 %v2923_v27  ;;  %2701 = vmatprep.subr.bf16.mxu0 %v2924_v28  ;;  %v2925_v36 = vld [vmem:[%s3151_s29 + $0x68] sm:$0xff]   ;;  %v2926_v37 = vld [vmem:[%s3151_s29 + $0x70] sm:$0xff]   ;;  %v2928_v39 = vld [vmem:[%s3151_s29 + $0x78] sm:$0xff]  }
  0x24   : > { %v2927_v38 = vld [vmem:[%s3151_s29 + $0x70] sm:$0xff]   ;;  %v2929_v40 = vld [vmem:[%s3151_s29 + $0x78] sm:$0xff]   ;;  %v2930_v41 = vld [vmem:[%s3151_s29 + $0x80] sm:$0xff]  }
  0x25   : > { %2594 = vmatmul.mubr.msk.bf16.gmra.mrb[4].mxu1 %vm450_vm0, %v2903_v14  ;;  %2670 = vmatmul.mubr.msk.bf16.gmra.mrb[4].mxu0 %vm450_vm0, %v2904_v15  ;;  %v2931_v42 = vld [vmem:[%s3151_s29 + $0x80] sm:$0xff]   ;;  %v2932_v43 = vld [vmem:[%s3151_s29 + $0x88] sm:$0xff]   ;;  %v2934_v45 = vld [vmem:[%s3151_s29 + $0x18] sm:$0xff]  }
  0x26   : > { %2597 = vmatprep.mubr.msk.bf16.mxu1 %vm450_vm0, %v2905_v16  ;;  %2673 = vmatprep.mubr.msk.bf16.mxu0 %vm450_vm0, %v2906_v17  ;;  %v2933_v44 = vld [vmem:[%s3151_s29] sm:$0xff]   ;;  %v2935_v46 = vld [vmem:[%s3151_s29 + $0x8] sm:$0xff]   ;;  %v2937_v48 = vld [vmem:[%s3151_s29 + $0x10] sm:$0xff]  }
  0x27   : > { %2626 = vmatpush3.bf16.msra.mxu1 %v2923_v27  ;;  %2702 = vmatpush3.bf16.msra.mxu0 %v2924_v28  ;;  %v2936_v47 = vld [vmem:[%s3151_s29 + $0x20] sm:$0xff]   ;;  %v2938_v49 = vld [vmem:[%s3151_s29 + $0x28] sm:$0xff]   ;;  %v2939_v50 = vld [vmem:[%s3151_s29 + $0x18] sm:$0xff]  }
  0x28   : > { %v2940_v51 = vld [vmem:[%s3151_s29 + $0x30] sm:$0xff]   ;;  %v2941_v52 = vld [vmem:[%s3151_s29 + $0x20] sm:$0xff]   ;;  %v2942_v53 = vld [vmem:[%s3151_s29 + $0x38] sm:$0xff]  }
  0x29   : > { %v2943_v54 = vld [vmem:[%s3151_s29 + $0x28] sm:$0xff]   ;;  %v2944_v55 = vld [vmem:[%s3151_s29 + $0x40] sm:$0xff]   ;;  %v2945_v56 = vld [vmem:[%s3151_s29 + $0x30] sm:$0xff]  }
  0x2a   : > { %v2946_v57 = vld [vmem:[%s3151_s29 + $0x48] sm:$0xff]   ;;  %v2947_v58 = vld [vmem:[%s3151_s29 + $0x38] sm:$0xff]   ;;  %v2948_v59 = vld [vmem:[%s3151_s29 + $0x50] sm:$0xff]  }
  0x2b   : > { %v2949_v60 = vld [vmem:[%s3151_s29 + $0x40] sm:$0xff]   ;;  %v2950_v61 = vld [vmem:[%s3151_s29 + $0x58] sm:$0xff]   ;;  %v2951_v62 = vld [vmem:[%s3151_s29 + $0x48] sm:$0xff]  }
  0x2c   : > { %v2952_v63 = vld [vmem:[%s3151_s29 + $0x60] sm:$0xff]   ;;  %v2953_v0 = vld [vmem:[%s3151_s29 + $0x50] sm:$0xff]   ;;  %v2954_v1 = vld [vmem:[%s3151_s29 + $0x68] sm:$0xff]  }
  0x2d   : > { %2598 = vmatmul.mubr.msk.bf16.gmra.mrb[8].mxu1 %vm450_vm0, %v2907_v20  ;;  %2674 = vmatmul.mubr.msk.bf16.gmra.mrb[8].mxu0 %vm450_vm0, %v2908_v21  ;;  %v2955_v2 = vld [vmem:[%s3151_s29 + $0x58] sm:$0xff]   ;;  %v2956_v3 = vld [vmem:[%s3151_s29 + $0x70] sm:$0xff]   ;;  %v2957_v4 = vld [vmem:[%s3151_s29 + $0x60] sm:$0xff]  }
  0x2e   : > { %2601 = vmatprep.mubr.msk.bf16.mxu1 %vm450_vm0, %v2911_v22  ;;  %2677 = vmatprep.mubr.msk.bf16.mxu0 %vm450_vm0, %v2912_v23  ;;  %v2958_v5 = vld [vmem:[%s3151_s29 + $0x78] sm:$0xff]   ;;  %v2959_v6 = vld [vmem:[%s3151_s29 + $0x68] sm:$0xff]   ;;  %v2960_v7 = vld [vmem:[%s3151_s29 + $0x80] sm:$0xff]  }
  0x2f   : > { %v2961_v8 = vld [vmem:[%s3151_s29 + $0x70] sm:$0xff]   ;;  %v2962_v9 = vld [vmem:[%s3151_s29 + $0x88] sm:$0xff]   ;;  %v2963_v10 = vld [vmem:[%s3151_s29 + $0x78] sm:$0xff]  }
  0x30   : > { %v2964_v11 = vld [vmem:[%s3151_s29 + $0x90] sm:$0xff]   ;;  %v3302_v14 = vld [vmem:[%s3501_s2] ss:$0 sm:$0xff]  ;;  %s2167_s29 = sshll.u32 %s246_s26, 7 }
  0x31   : > { %v3308_v19 = vld [vmem:[%s3502_s3] ss:$0 sm:$0xff]  ;;  %s3320_s6 = scalar_lea.vmem [#allocation2], %s2167_s29 }
  0x32   : > { %s2035_s8 = sshll.u32 %s3320_s6, 4  ;;  %s3443_s8 = int_to_ptr.vmem [resolvable:$true] %s2035_s8 }
  0x33   : > { %s2965_s12 = scalar_lea.vmem %s3443_s8, 2048  ;;  %p2972_p1 = scmp.lt.s32.totalorder %s3443_s8, %s2970_s14 }
  0x34   : > { %p2966_p12 = scmp.ne.s32.totalorder %s3443_s8, %s2965_s12  ;;  %p2973_p2 = scmp.lt.s32.totalorder %s2971_s21, %s2965_s12 }
  0x35   : > { %2602 = vmatmul.mubr.msk.bf16.gmra.mrb[12].mxu1 %vm450_vm0, %v2913_v24  ;;  %2678 = vmatmul.mubr.msk.bf16.gmra.mrb[12].mxu0 %vm450_vm0, %v2914_v25 }
  0x36   : > { %2605 = vmatprep.mubr.msk.bf16.mxu1 %vm450_vm0, %v2915_v26  ;;  %2681 = vmatprep.mubr.msk.bf16.mxu0 %vm450_vm0, %v2916_v29  ;;  %p2967_p13 = pnand %p2966_p12, %p3113_p4  ;;  %p2974_p3 = por %p2973_p2, %p2972_p1 }
  0x38   : > { %p2968_p0 = pneg %p2967_p13 }
  0x3a   : > { %p2975_p5 = pnand %p2974_p3, %p2968_p0 }
  0x3d   : > { %2606 = vmatmul.mubr.msk.bf16.gmra.mrb[16].mxu1 %vm450_vm0, %v2917_v30  ;;  %2682 = vmatmul.mubr.msk.bf16.gmra.mrb[16].mxu0 %vm450_vm0, %v2918_v31 }
  0x3e   : > { %2609 = vmatprep.mubr.msk.bf16.mxu1 %vm450_vm0, %v2919_v32  ;;  %2685 = vmatprep.mubr.msk.bf16.mxu0 %vm450_vm0, %v2920_v33 }
  0x45   : > { %2610 = vmatmul.mubr.msk.bf16.gmra.mrb[20].mxu1 %vm450_vm0, %v2921_v34  ;;  %2686 = vmatmul.mubr.msk.bf16.gmra.mrb[20].mxu0 %vm450_vm0, %v2922_v35 }
  0x46   : > { %2613 = vmatprep.mubr.msk.bf16.mxu1 %vm450_vm0, %v2925_v36  ;;  %2689 = vmatprep.mubr.msk.bf16.mxu0 %vm450_vm0, %v2926_v37 }
  0x4d   : > { %2614 = vmatmul.mubr.msk.bf16.gmra.mrb[24].mxu1 %vm450_vm0, %v2927_v38  ;;  %2690 = vmatmul.mubr.msk.bf16.gmra.mrb[24].mxu0 %vm450_vm0, %v2928_v39 }
  0x4e   : > { %2617 = vmatprep.mubr.msk.bf16.mxu1 %vm450_vm0, %v2929_v40  ;;  %2693 = vmatprep.mubr.msk.bf16.mxu0 %vm450_vm0, %v2930_v41 }
  0x55   : > { %2618 = vmatmul.mubr.msk.bf16.gmra.mrb[28].mxu1 %vm450_vm0, %v2931_v42  ;;  %2694 = vmatmul.mubr.msk.bf16.gmra.mrb[28].mxu0 %vm450_vm0, %v2932_v43 }
  0x56   : > { %2627 = vmatprep.mubr.msk.bf16.mxu1 %vm450_vm0, %v2933_v44  ;;  %2703 = vmatprep.mubr.msk.bf16.mxu0 %vm450_vm0, %v2934_v45 }
  0x5d   : > { %2628 = vmatmul.mubr.msk.bf16.vlgmr.msra.gmra.mrb[0].mxu1 %vm450_vm0, %v2935_v46  ;;  %2704 = vmatmul.mubr.msk.bf16.vlgmr.msra.gmra.mrb[0].mxu0 %vm450_vm0, %v2936_v47 }
  0x5e   : > { %2631 = vmatprep.mubr.msk.bf16.mxu1 %vm450_vm0, %v2937_v48  ;;  %2707 = vmatprep.mubr.msk.bf16.mxu0 %vm450_vm0, %v2938_v49 }
  0x65   : > { %2632 = vmatmul.mubr.msk.bf16.gmra.mrb[4].mxu1 %vm450_vm0, %v2939_v50  ;;  %2708 = vmatmul.mubr.msk.bf16.gmra.mrb[4].mxu0 %vm450_vm0, %v2940_v51 }
  0x66   : > { %2635 = vmatprep.mubr.msk.bf16.mxu1 %vm450_vm0, %v2941_v52  ;;  %2711 = vmatprep.mubr.msk.bf16.mxu0 %vm450_vm0, %v2942_v53 }
  0x6d   : > { %2636 = vmatmul.mubr.msk.bf16.gmra.mrb[8].mxu1 %vm450_vm0, %v2943_v54  ;;  %2712 = vmatmul.mubr.msk.bf16.gmra.mrb[8].mxu0 %vm450_vm0, %v2944_v55 }
  0x6e   : > { %2639 = vmatprep.mubr.msk.bf16.mxu1 %vm450_vm0, %v2945_v56  ;;  %2715 = vmatprep.mubr.msk.bf16.mxu0 %vm450_vm0, %v2946_v57 }
  0x75   : > { %2640 = vmatmul.mubr.msk.bf16.gmra.mrb[12].mxu1 %vm450_vm0, %v2947_v58  ;;  %2716 = vmatmul.mubr.msk.bf16.gmra.mrb[12].mxu0 %vm450_vm0, %v2948_v59 }
  0x76   : > { %2643 = vmatprep.mubr.msk.bf16.mxu1 %vm450_vm0, %v2949_v60  ;;  %2719 = vmatprep.mubr.msk.bf16.mxu0 %vm450_vm0, %v2950_v61 }
  0x7d   : > { %2644 = vmatmul.mubr.msk.bf16.gmra.mrb[16].mxu1 %vm450_vm0, %v2951_v62  ;;  %2720 = vmatmul.mubr.msk.bf16.gmra.mrb[16].mxu0 %vm450_vm0, %v2952_v63 }
  0x7e   : > { %2647 = vmatprep.mubr.msk.bf16.mxu1 %vm450_vm0, %v2953_v0  ;;  %2723 = vmatprep.mubr.msk.bf16.mxu0 %vm450_vm0, %v2954_v1 }
  0x85   : > { %2648 = vmatmul.mubr.msk.bf16.gmra.mrb[20].mxu1 %vm450_vm0, %v2955_v2  ;;  %2724 = vmatmul.mubr.msk.bf16.gmra.mrb[20].mxu0 %vm450_vm0, %v2956_v3 }
  0x86   : > { %2651 = vmatprep.mubr.msk.bf16.mxu1 %vm450_vm0, %v2957_v4  ;;  %2727 = vmatprep.mubr.msk.bf16.mxu0 %vm450_vm0, %v2958_v5 }
  0x8d   : > { %2652 = vmatmul.mubr.msk.bf16.gmra.mrb[24].mxu1 %vm450_vm0, %v2959_v6  ;;  %2728 = vmatmul.mubr.msk.bf16.gmra.mrb[24].mxu0 %vm450_vm0, %v2960_v7 }
  0x8e   : > { %2655 = vmatprep.mubr.msk.bf16.mxu1 %vm450_vm0, %v2961_v8  ;;  %2731 = vmatprep.mubr.msk.bf16.mxu0 %vm450_vm0, %v2962_v9 }
  0x95   : > { %2656 = vmatmul.mubr.msk.bf16.gmra.mrb[28].mxu1 %vm450_vm0, %v2963_v10  ;;  %2732 = vmatmul.mubr.msk.bf16.gmra.mrb[28].mxu0 %vm450_vm0, %v2964_v11 }
 0x130   : > { %v2629_v12 = vpop.f32.mrb[0].mxu1  ;;  %v2705_v13 = vpop.f32.mrb[0].mxu0 }
 0x131   : > { %v840_v15 = vpop.f32.mrb[1].mxu1  ;;  %v2735_v16 = vadd.f32 %v2705_v13, %v2629_v12  ;;  %v1572_v17 = vpop.f32.mrb[1].mxu0 }
 0x132   : > { %v2630_v18 = vpop.f32.mrb[2].mxu1  ;;  %v2736_v20 = vadd.f32 %v1572_v17, %v840_v15  ;;  %v2706_v21 = vpop.f32.mrb[2].mxu0 }
 0x133   : > { %v843_v22 = vpop.f32.mrb[3].mxu1  ;;  %v1740_v23 = vmul.f32 %v2735_v16, %v3302_v14  ;;  %v2737_v24 = vadd.f32 %v2706_v21, %v2630_v18  ;;  %v1575_v25 = vpop.f32.mrb[3].mxu0 }
 0x134   : > { %v1738_v26 = vmul.f32 %v2736_v20, %v3302_v14  ;;  %v2738_v27 = vadd.f32 %v1575_v25, %v843_v22 }
 0x135   : > { %v1779_v28 = vadd.f32 %v3308_v19, %v1740_v23  ;;  %v1741_v29 = vmul.f32 %v2737_v24, %v3302_v14 }
 0x136   : > { %v1777_v30 = vadd.f32 %v3308_v19, %v1738_v26  ;;  %v1739_v31 = vmul.f32 %v2738_v27, %v3302_v14 }
 0x137   : > { %v1811_v32 = vmax.f32 %v1779_v28, 0.0  ;;  %v1780_v33 = vadd.f32 %v3308_v19, %v1741_v29 }
 0x138   : > { %v2633_v34 = vpop.f32.mrb[4].mxu1  ;;  %v1809_v35 = vmax.f32 %v1777_v30, 0.0  ;;  %v1778_v36 = vadd.f32 %v3308_v19, %v1739_v31  ;;  %v2709_v37 = vpop.f32.mrb[4].mxu0 }
 0x139   : > { %v856_v38 = vpop.f32.mrb[5].mxu1  ;;  %v2476_v39 = vpack.c.bf16 %v1811_v32, %v1811_v32  ;;  %v1812_v40 = vmax.f32 %v1780_v33, 0.0  ;;  %v2739_v41 = vadd.f32 %v2709_v37, %v2633_v34  ;;  %v1588_v42 = vpop.f32.mrb[5].mxu0 }
 0x13a   : > { %v2634_v43 = vpop.f32.mrb[6].mxu1  ;;  %v2474_v44 = vpack.c.bf16 %v1809_v35, %v1809_v35  ;;  %v1810_v45 = vmax.f32 %v1778_v36, 0.0  ;;  %v2740_v46 = vadd.f32 %v1588_v42, %v856_v38  ;;  %v2710_v47 = vpop.f32.mrb[6].mxu0 }
 0x13b   : > { %v859_v48 = vpop.f32.mrb[7].mxu1  ;;  %2411 = vst.msk [vmem:[%s3320_s6 + $0x8] sm:$0xf] %vm1864_vm1, %v2476_v39  ;;  %v2477_v49 = vpack.c.bf16 %v1812_v40, %v1812_v40  ;;  %v1744_v50 = vmul.f32 %v2739_v41, %v3302_v14  ;;  %v2741_v51 = vadd.f32 %v2710_v47, %v2634_v43  ;;  %v1591_v52 = vpop.f32.mrb[7].mxu0 }
 0x13c   : > { %1865 = vst.msk [vmem:[%s3320_s6] sm:$0xf] %vm1864_vm1, %v2474_v44  ;;  %v2475_v53 = vpack.c.bf16 %v1810_v45, %v1810_v45  ;;  %v1742_v54 = vmul.f32 %v2740_v46, %v3302_v14  ;;  %v2742_v55 = vadd.f32 %v1591_v52, %v859_v48 }
 0x13d   : > { %2412 = vst.msk [vmem:[%s3320_s6 + $0xc] sm:$0xf] %vm1864_vm1, %v2477_v49  ;;  %v1783_v56 = vadd.f32 %v3308_v19, %v1744_v50  ;;  %v1745_v57 = vmul.f32 %v2741_v51, %v3302_v14 }
 0x13e   : > { %1866 = vst.msk [vmem:[%s3320_s6 + $0x4] sm:$0xf] %vm1864_vm1, %v2475_v53  ;;  %v1781_v58 = vadd.f32 %v3308_v19, %v1742_v54  ;;  %v1743_v59 = vmul.f32 %v2742_v55, %v3302_v14 }
 0x13f   : > { %v1815_v60 = vmax.f32 %v1783_v56, 0.0  ;;  %v1784_v61 = vadd.f32 %v3308_v19, %v1745_v57 }
 0x140   : > { %v2637_v62 = vpop.f32.mrb[8].mxu1  ;;  %v1813_v63 = vmax.f32 %v1781_v58, 0.0  ;;  %v1782_v0 = vadd.f32 %v3308_v19, %v1743_v59  ;;  %v2713_v1 = vpop.f32.mrb[8].mxu0 }
 0x141   : > { %v872_v2 = vpop.f32.mrb[9].mxu1  ;;  %v2480_v3 = vpack.c.bf16 %v1815_v60, %v1815_v60  ;;  %v1816_v4 = vmax.f32 %v1784_v61, 0.0  ;;  %v2743_v5 = vadd.f32 %v2713_v1, %v2637_v62  ;;  %v1604_v6 = vpop.f32.mrb[9].mxu0 }
 0x142   : > { %v2638_v7 = vpop.f32.mrb[10].mxu1  ;;  %v2478_v8 = vpack.c.bf16 %v1813_v63, %v1813_v63  ;;  %v1814_v9 = vmax.f32 %v1782_v0, 0.0  ;;  %v2744_v10 = vadd.f32 %v1604_v6, %v872_v2  ;;  %v2714_v11 = vpop.f32.mrb[10].mxu0 }
 0x143   : > { %v875_v12 = vpop.f32.mrb[11].mxu1  ;;  %2419 = vst.msk [vmem:[%s3320_s6 + $0x18] sm:$0xf] %vm1864_vm1, %v2480_v3  ;;  %v2481_v13 = vpack.c.bf16 %v1816_v4, %v1816_v4  ;;  %v1748_v15 = vmul.f32 %v2743_v5, %v3302_v14  ;;  %v2745_v16 = vadd.f32 %v2714_v11, %v2638_v7  ;;  %v1607_v17 = vpop.f32.mrb[11].mxu0 }
 0x144   : > { %2415 = vst.msk [vmem:[%s3320_s6 + $0x10] sm:$0xf] %vm1864_vm1, %v2478_v8  ;;  %v2479_v18 = vpack.c.bf16 %v1814_v9, %v1814_v9  ;;  %v1746_v20 = vmul.f32 %v2744_v10, %v3302_v14  ;;  %v2746_v21 = vadd.f32 %v1607_v17, %v875_v12 }
 0x145   : > { %2420 = vst.msk [vmem:[%s3320_s6 + $0x1c] sm:$0xf] %vm1864_vm1, %v2481_v13  ;;  %v1787_v22 = vadd.f32 %v3308_v19, %v1748_v15  ;;  %v1749_v23 = vmul.f32 %v2745_v16, %v3302_v14 }
 0x146   : > { %2416 = vst.msk [vmem:[%s3320_s6 + $0x14] sm:$0xf] %vm1864_vm1, %v2479_v18  ;;  %v1785_v24 = vadd.f32 %v3308_v19, %v1746_v20  ;;  %v1747_v25 = vmul.f32 %v2746_v21, %v3302_v14 }
 0x147   : > { %v1819_v26 = vmax.f32 %v1787_v22, 0.0  ;;  %v1788_v27 = vadd.f32 %v3308_v19, %v1749_v23 }
 0x148   : > { %v2641_v28 = vpop.f32.mrb[12].mxu1  ;;  %v1817_v29 = vmax.f32 %v1785_v24, 0.0  ;;  %v1786_v30 = vadd.f32 %v3308_v19, %v1747_v25  ;;  %v2717_v31 = vpop.f32.mrb[12].mxu0 }
 0x149   : > { %v888_v32 = vpop.f32.mrb[13].mxu1  ;;  %v2484_v33 = vpack.c.bf16 %v1819_v26, %v1819_v26  ;;  %v1820_v34 = vmax.f32 %v1788_v27, 0.0  ;;  %v2747_v35 = vadd.f32 %v2717_v31, %v2641_v28  ;;  %v1620_v36 = vpop.f32.mrb[13].mxu0 }
 0x14a   : > { %v2642_v37 = vpop.f32.mrb[14].mxu1  ;;  %v2482_v38 = vpack.c.bf16 %v1817_v29, %v1817_v29  ;;  %v1818_v39 = vmax.f32 %v1786_v30, 0.0  ;;  %v2748_v40 = vadd.f32 %v1620_v36, %v888_v32  ;;  %v2718_v41 = vpop.f32.mrb[14].mxu0 }
 0x14b   : > { %v891_v42 = vpop.f32.mrb[15].mxu1  ;;  %2427 = vst.msk [vmem:[%s3320_s6 + $0x28] sm:$0xf] %vm1864_vm1, %v2484_v33  ;;  %v2485_v43 = vpack.c.bf16 %v1820_v34, %v1820_v34  ;;  %v1752_v44 = vmul.f32 %v2747_v35, %v3302_v14  ;;  %v2749_v45 = vadd.f32 %v2718_v41, %v2642_v37  ;;  %v1623_v46 = vpop.f32.mrb[15].mxu0 }
 0x14c   : > { %2423 = vst.msk [vmem:[%s3320_s6 + $0x20] sm:$0xf] %vm1864_vm1, %v2482_v38  ;;  %v2483_v47 = vpack.c.bf16 %v1818_v39, %v1818_v39  ;;  %v1750_v48 = vmul.f32 %v2748_v40, %v3302_v14  ;;  %v2750_v49 = vadd.f32 %v1623_v46, %v891_v42 }
 0x14d   : > { %2428 = vst.msk [vmem:[%s3320_s6 + $0x2c] sm:$0xf] %vm1864_vm1, %v2485_v43  ;;  %v1791_v50 = vadd.f32 %v3308_v19, %v1752_v44  ;;  %v1753_v51 = vmul.f32 %v2749_v45, %v3302_v14 }
 0x14e   : > { %2424 = vst.msk [vmem:[%s3320_s6 + $0x24] sm:$0xf] %vm1864_vm1, %v2483_v47  ;;  %v1789_v52 = vadd.f32 %v3308_v19, %v1750_v48  ;;  %v1751_v53 = vmul.f32 %v2750_v49, %v3302_v14 }
 0x14f   : > { %v1823_v54 = vmax.f32 %v1791_v50, 0.0  ;;  %v1792_v55 = vadd.f32 %v3308_v19, %v1753_v51 }
 0x150   : > { %v2645_v56 = vpop.f32.mrb[16].mxu1  ;;  %v1821_v57 = vmax.f32 %v1789_v52, 0.0  ;;  %v1790_v58 = vadd.f32 %v3308_v19, %v1751_v53  ;;  %v2721_v59 = vpop.f32.mrb[16].mxu0 }
 0x151   : > { %v904_v60 = vpop.f32.mrb[17].mxu1  ;;  %v2488_v61 = vpack.c.bf16 %v1823_v54, %v1823_v54  ;;  %v1824_v62 = vmax.f32 %v1792_v55, 0.0  ;;  %v2751_v63 = vadd.f32 %v2721_v59, %v2645_v56  ;;  %v1636_v0 = vpop.f32.mrb[17].mxu0 }
 0x152   : > { %v2646_v1 = vpop.f32.mrb[18].mxu1  ;;  %v2486_v2 = vpack.c.bf16 %v1821_v57, %v1821_v57  ;;  %v1822_v3 = vmax.f32 %v1790_v58, 0.0  ;;  %v2752_v4 = vadd.f32 %v1636_v0, %v904_v60  ;;  %v2722_v5 = vpop.f32.mrb[18].mxu0 }
 0x153   : > { %v907_v6 = vpop.f32.mrb[19].mxu1  ;;  %2435 = vst.msk [vmem:[%s3320_s6 + $0x38] sm:$0xf] %vm1864_vm1, %v2488_v61  ;;  %v2489_v7 = vpack.c.bf16 %v1824_v62, %v1824_v62  ;;  %v1756_v8 = vmul.f32 %v2751_v63, %v3302_v14  ;;  %v2753_v9 = vadd.f32 %v2722_v5, %v2646_v1  ;;  %v1639_v10 = vpop.f32.mrb[19].mxu0 }
 0x154   : > { %2431 = vst.msk [vmem:[%s3320_s6 + $0x30] sm:$0xf] %vm1864_vm1, %v2486_v2  ;;  %v2487_v11 = vpack.c.bf16 %v1822_v3, %v1822_v3  ;;  %v1754_v12 = vmul.f32 %v2752_v4, %v3302_v14  ;;  %v2754_v13 = vadd.f32 %v1639_v10, %v907_v6 }
 0x155   : > { %2436 = vst.msk [vmem:[%s3320_s6 + $0x3c] sm:$0xf] %vm1864_vm1, %v2489_v7  ;;  %v1795_v15 = vadd.f32 %v3308_v19, %v1756_v8  ;;  %v1757_v16 = vmul.f32 %v2753_v9, %v3302_v14 }
 0x156   : > { %2432 = vst.msk [vmem:[%s3320_s6 + $0x34] sm:$0xf] %vm1864_vm1, %v2487_v11  ;;  %v1793_v17 = vadd.f32 %v3308_v19, %v1754_v12  ;;  %v1755_v18 = vmul.f32 %v2754_v13, %v3302_v14 }
 0x157   : > { %v1827_v20 = vmax.f32 %v1795_v15, 0.0  ;;  %v1796_v21 = vadd.f32 %v3308_v19, %v1757_v16 }
 0x158   : > { %v2649_v22 = vpop.f32.mrb[20].mxu1  ;;  %v1825_v23 = vmax.f32 %v1793_v17, 0.0  ;;  %v1794_v24 = vadd.f32 %v3308_v19, %v1755_v18  ;;  %v2725_v25 = vpop.f32.mrb[20].mxu0 }
 0x159   : > { %v920_v26 = vpop.f32.mrb[21].mxu1  ;;  %v2492_v27 = vpack.c.bf16 %v1827_v20, %v1827_v20  ;;  %v1828_v28 = vmax.f32 %v1796_v21, 0.0  ;;  %v2755_v29 = vadd.f32 %v2725_v25, %v2649_v22  ;;  %v1652_v30 = vpop.f32.mrb[21].mxu0 }
 0x15a   : > { %v2650_v31 = vpop.f32.mrb[22].mxu1  ;;  %v2490_v32 = vpack.c.bf16 %v1825_v23, %v1825_v23  ;;  %v1826_v33 = vmax.f32 %v1794_v24, 0.0  ;;  %v2756_v34 = vadd.f32 %v1652_v30, %v920_v26  ;;  %v2726_v35 = vpop.f32.mrb[22].mxu0 }
 0x15b   : > { %v923_v36 = vpop.f32.mrb[23].mxu1  ;;  %2443 = vst.msk [vmem:[%s3320_s6 + $0x48] sm:$0xf] %vm1864_vm1, %v2492_v27  ;;  %v2493_v37 = vpack.c.bf16 %v1828_v28, %v1828_v28  ;;  %v1760_v38 = vmul.f32 %v2755_v29, %v3302_v14  ;;  %v2757_v39 = vadd.f32 %v2726_v35, %v2650_v31  ;;  %v1655_v40 = vpop.f32.mrb[23].mxu0 }
 0x15c   : > { %2439 = vst.msk [vmem:[%s3320_s6 + $0x40] sm:$0xf] %vm1864_vm1, %v2490_v32  ;;  %v2491_v41 = vpack.c.bf16 %v1826_v33, %v1826_v33  ;;  %v1758_v42 = vmul.f32 %v2756_v34, %v3302_v14  ;;  %v2758_v43 = vadd.f32 %v1655_v40, %v923_v36 }
 0x15d   : > { %2444 = vst.msk [vmem:[%s3320_s6 + $0x4c] sm:$0xf] %vm1864_vm1, %v2493_v37  ;;  %v1799_v44 = vadd.f32 %v3308_v19, %v1760_v38  ;;  %v1761_v45 = vmul.f32 %v2757_v39, %v3302_v14 }
 0x15e   : > { %2440 = vst.msk [vmem:[%s3320_s6 + $0x44] sm:$0xf] %vm1864_vm1, %v2491_v41  ;;  %v1797_v46 = vadd.f32 %v3308_v19, %v1758_v42  ;;  %v1759_v47 = vmul.f32 %v2758_v43, %v3302_v14 }
 0x15f   : > { %v1831_v48 = vmax.f32 %v1799_v44, 0.0  ;;  %v1800_v49 = vadd.f32 %v3308_v19, %v1761_v45 }
 0x160   : > { %v2653_v50 = vpop.f32.mrb[24].mxu1  ;;  %v1829_v51 = vmax.f32 %v1797_v46, 0.0  ;;  %v1798_v52 = vadd.f32 %v3308_v19, %v1759_v47  ;;  %v2729_v53 = vpop.f32.mrb[24].mxu0 }
 0x161   : > { %v936_v54 = vpop.f32.mrb[25].mxu1  ;;  %v2496_v55 = vpack.c.bf16 %v1831_v48, %v1831_v48  ;;  %v1832_v56 = vmax.f32 %v1800_v49, 0.0  ;;  %v2759_v57 = vadd.f32 %v2729_v53, %v2653_v50  ;;  %v1668_v58 = vpop.f32.mrb[25].mxu0 }
 0x162   : > { %v2654_v59 = vpop.f32.mrb[26].mxu1  ;;  %v2494_v60 = vpack.c.bf16 %v1829_v51, %v1829_v51  ;;  %v1830_v61 = vmax.f32 %v1798_v52, 0.0  ;;  %v2760_v62 = vadd.f32 %v1668_v58, %v936_v54  ;;  %v2730_v63 = vpop.f32.mrb[26].mxu0 }
 0x163   : > { %v939_v0 = vpop.f32.mrb[27].mxu1  ;;  %2451 = vst.msk [vmem:[%s3320_s6 + $0x58] sm:$0xf] %vm1864_vm1, %v2496_v55  ;;  %v2497_v1 = vpack.c.bf16 %v1832_v56, %v1832_v56  ;;  %v1764_v2 = vmul.f32 %v2759_v57, %v3302_v14  ;;  %v2761_v3 = vadd.f32 %v2730_v63, %v2654_v59  ;;  %v1671_v4 = vpop.f32.mrb[27].mxu0 }
 0x164   : > { %2447 = vst.msk [vmem:[%s3320_s6 + $0x50] sm:$0xf] %vm1864_vm1, %v2494_v60  ;;  %v2495_v5 = vpack.c.bf16 %v1830_v61, %v1830_v61  ;;  %v1762_v6 = vmul.f32 %v2760_v62, %v3302_v14  ;;  %v2762_v7 = vadd.f32 %v1671_v4, %v939_v0 }
 0x165   : > { %2452 = vst.msk [vmem:[%s3320_s6 + $0x5c] sm:$0xf] %vm1864_vm1, %v2497_v1  ;;  %v1803_v8 = vadd.f32 %v3308_v19, %v1764_v2  ;;  %v1765_v9 = vmul.f32 %v2761_v3, %v3302_v14 }
 0x166   : > { %2448 = vst.msk [vmem:[%s3320_s6 + $0x54] sm:$0xf] %vm1864_vm1, %v2495_v5  ;;  %v1801_v10 = vadd.f32 %v3308_v19, %v1762_v6  ;;  %v1763_v11 = vmul.f32 %v2762_v7, %v3302_v14 }
 0x167   : > { %v1835_v12 = vmax.f32 %v1803_v8, 0.0  ;;  %v1804_v13 = vadd.f32 %v3308_v19, %v1765_v9 }
 0x168   : > { %v2657_v15 = vpop.f32.mrb[28].mxu1  ;;  %v1833_v16 = vmax.f32 %v1801_v10, 0.0  ;;  %v1802_v17 = vadd.f32 %v3308_v19, %v1763_v11  ;;  %v2733_v18 = vpop.f32.mrb[28].mxu0 }
 0x169   : > { %v952_v20 = vpop.f32.mrb[29].mxu1  ;;  %v2500_v21 = vpack.c.bf16 %v1835_v12, %v1835_v12  ;;  %v1836_v22 = vmax.f32 %v1804_v13, 0.0  ;;  %v2763_v23 = vadd.f32 %v2733_v18, %v2657_v15  ;;  %v1684_v24 = vpop.f32.mrb[29].mxu0 }
 0x16a   : > { %v2658_v25 = vpop.f32.mrb[30].mxu1  ;;  %v2498_v26 = vpack.c.bf16 %v1833_v16, %v1833_v16  ;;  %v1834_v27 = vmax.f32 %v1802_v17, 0.0  ;;  %v2764_v28 = vadd.f32 %v1684_v24, %v952_v20  ;;  %v2734_v29 = vpop.f32.mrb[30].mxu0 }
 0x16b   : > { %v955_v30 = vpop.f32.mrb[31].mxu1  ;;  %2459 = vst.msk [vmem:[%s3320_s6 + $0x68] sm:$0xf] %vm1864_vm1, %v2500_v21  ;;  %v2501_v31 = vpack.c.bf16 %v1836_v22, %v1836_v22  ;;  %v1768_v32 = vmul.f32 %v2763_v23, %v3302_v14  ;;  %v2765_v33 = vadd.f32 %v2734_v29, %v2658_v25  ;;  %v1687_v34 = vpop.f32.mrb[31].mxu0 }
 0x16c   : > { %2455 = vst.msk [vmem:[%s3320_s6 + $0x60] sm:$0xf] %vm1864_vm1, %v2498_v26  ;;  %v2499_v35 = vpack.c.bf16 %v1834_v27, %v1834_v27  ;;  %v1766_v36 = vmul.f32 %v2764_v28, %v3302_v14  ;;  %v2766_v37 = vadd.f32 %v1687_v34, %v955_v30 }
 0x16d   : > { %2460 = vst.msk [vmem:[%s3320_s6 + $0x6c] sm:$0xf] %vm1864_vm1, %v2501_v31  ;;  %v1807_v38 = vadd.f32 %v3308_v19, %v1768_v32  ;;  %v1769_v39 = vmul.f32 %v2765_v33, %v3302_v14 }
 0x16e   : > { %2456 = vst.msk [vmem:[%s3320_s6 + $0x64] sm:$0xf] %vm1864_vm1, %v2499_v35  ;;  %v1805_v40 = vadd.f32 %v3308_v19, %v1766_v36  ;;  %v1767_v41 = vmul.f32 %v2766_v37, %v3302_v14 }
 0x16f   : > { %v1839_v42 = vmax.f32 %v1807_v38, 0.0  ;;  %v1808_v43 = vadd.f32 %v3308_v19, %v1769_v39 }
 0x170   : > { %v1837_v44 = vmax.f32 %v1805_v40, 0.0  ;;  %v1806_v45 = vadd.f32 %v3308_v19, %v1767_v41 }
 0x171   : > { %v2504_v46 = vpack.c.bf16 %v1839_v42, %v1839_v42  ;;  %v1840_v47 = vmax.f32 %v1808_v43, 0.0 }
 0x172   : > { %v2502_v48 = vpack.c.bf16 %v1837_v44, %v1837_v44  ;;  %v1838_v49 = vmax.f32 %v1806_v45, 0.0 }
 0x173   : > { %2467 = vst.msk [vmem:[%s3320_s6 + $0x78] sm:$0xf] %vm1864_vm1, %v2504_v46  ;;  %v2505_v50 = vpack.c.bf16 %v1840_v47, %v1840_v47 }
 0x174   : > { %2463 = vst.msk [vmem:[%s3320_s6 + $0x70] sm:$0xf] %vm1864_vm1, %v2502_v48  ;;  %v2503_v14 = vpack.c.bf16 %v1838_v49, %v1838_v49 }
 0x175   : > { %2468 = vst.msk [vmem:[%s3320_s6 + $0x7c] sm:$0xf] %vm1864_vm1, %v2505_v50 }
 0x176   : > { %2464 = vst.msk [vmem:[%s3320_s6 + $0x74] sm:$0xf] %vm1864_vm1, %v2503_v14 }
 0x177   : > { %2978 = shalt.err (!%p2975_p5)
}
 0x178   : > { %s2979_s22 = scalar_lea.hbm %s3441_s11, 2048  ;;  %s2983_s30 = scalar_lea.hbm %s3503_s4, 4096 }
 0x179   : > { %p2980_p6 = scmp.ne.s32.totalorder %s3441_s11, %s2979_s22  ;;  %p2984_p10 = scmp.lt.u32.totalorder %s3441_s11, %s3503_s4 }
 0x17a   : > { %p2985_p11 = scmp.lt.u32.totalorder %s2983_s30, %s2979_s22  ;;  %p2987_p13 = scmp.lt.u32.totalorder %s2979_s22, %s3441_s11 }
 0x17b   : > { %p2981_p7 = pnand %p2980_p6, %p3113_p4 }
 0x17c   : > { %p2986_p12 = por %p2985_p11, %p2984_p10 }
 0x17d   : > { %p2982_p9 = pneg %p2981_p7 }
 0x17e   : > { %p2988_p0 = por %p2987_p13, %p2986_p12 }
 0x180   : > { %p2989_p1 = pnand %p2988_p0, %p2982_p9 }
 0x182   : > { %2992 = shalt.err (!%p2989_p1)
}
 0x183   : > { %s3046_s6 = smov 64   ;;  %s3047_s7 = smov 4  }
 0x184   : > { %2832 = dma.vmem_to_hbm [thread:$0]  (%p3113_p4), %s3443_s8, 2048, %s3441_s11, %s3453_s18, %s3046_s6, %s3046_s6, %s3047_s7  }
 0x185 PF: > { %p2838_p2 = scmp.ge.s32.totalorder %s3043_s20, 2  ;;  %s2050_s9 = sand.u32 1, %s3023_s15  }
 0x186   : > { %s2051_s10 = scalar_lea.sflag [#allocation3], %s2050_s9 }
 0x187   : > { %p2835_p3 = pnand %p2838_p2, %p3120_p8 }
 0x189   : > { %3018 = dma.done.wait (!%p2835_p3), %s2051_s10, 2048  }
 0x18a   : > { %3020 = vsyncadd (!%p2835_p3), %s2051_s10, 4294965248  ;;  %s17_s20 = sadd.s32 1, %s3043_s20   ;;  %s3506_s15 = smov %s3027_s16 }
 0x18b   : > { %p14_p5 = scmp.ge.s32.totalorder %s17_s20, 4   ;;  %s3507_s16 = smov %s3031_s17 }
 0x18c   : > { %s3508_s17 = smov %s3126_s28  ;;  %s3509_s18 = smov %s3039_s19 }
 0x18d   : > { %s3510_s19 = smov %s3512_s23  ;;  %16 = sbr.rel (!%p14_p5) target bundleno = 4 (0x4), region = 99 }
 0x194   :  { %2056 = vsyncpa [#allocation3], 1 }
 0x195   :  { %2058 = vsyncpa [#allocation3 + $0x1], 1 }

</bundles_post_ra>
